<compile_context>
chip_gen: v7x
topology: tpu7x:2x2x1
jax: 0.10.0
libtpu: 0.0.40
codegen_flags: <defaults>
</compile_context>

<pallas_src>
import jax
import jax.numpy as jnp
from jax.experimental import pallas as pl
from jax.experimental.pallas import tpu as pltpu

EPS = 1e-9
LANE = 128
SUBLANE = 8


def _make_ifce_kernel(S, TR, need_mask):
    """Per-tile kernel. S = true (unpadded) spatial size, TR = rows per tile."""

    def kernel(p_ref, t_ref, loss_out_ref, inv_out_ref):
        # p_ref / t_ref: [N, C, TR, 128] VMEM tiles (spatial on sublane/lane).
        p = p_ref[...].astype(jnp.float32)
        t = t_ref[...].astype(jnp.float32)

        # ---- fused log-softmax over the channel axis (dim=1 in PyTorch) ----
        m = jnp.max(p, axis=1, keepdims=True)                      # [N,1,TR,128]
        z = p - m
        lse = jnp.log(jnp.sum(jnp.exp(z), axis=1, keepdims=True))  # [N,1,TR,128]
        log_sm = z - lse                                           # [N,C,TR,128]
        # TODO(synk): PyTorch computes log(softmax(x) + 1e-9); log-softmax drops
        # the +eps inside the log (differs only where softmax ~ 1e-9).

        # ---- un-normalized inverse-frequency weights: 1/(target.sum(0)+eps) ----
        tsum = jnp.sum(t, axis=0)                                  # [C,TR,128]
        inv = 1.0 / (tsum + EPS)                                   # [C,TR,128]

        # Partial sum of inv (for the global normalizer).  Padded spatial
        # columns would contribute 1/eps per class, so mask them out.
        inv_col = jnp.sum(inv, axis=0)                             # [TR,128]
        if need_mask:
            i = pl.program_id(0)
            row = jax.lax.broadcasted_iota(jnp.int32, (TR, LANE), 0)
            lane = jax.lax.broadcasted_iota(jnp.int32, (TR, LANE), 1)
            pos = (i * TR + row) * LANE + lane
            inv_col = jnp.where(pos < S, inv_col, 0.0)
        inv_out_ref[...] = jnp.sum(inv_col, axis=0, keepdims=True).reshape(1, 1, LANE)

        # ---- un-normalized loss partial: sum_{n,c,rows} t * inv * log_softmax ----
        # Padded columns contribute exactly 0 because target is zero-padded.
        contrib = t * inv[None] * log_sm                           # [N,C,TR,128]
        loss_out_ref[...] = jnp.sum(
            contrib, axis=(0, 1, 2), keepdims=True).reshape(1, 1, LANE)

    return kernel


def _choose_tile_rows(N, C, R, max_rows_per_tile=None):
    if max_rows_per_tile is None:
        # ~2 MiB per input block (f32) -> comfortably double-buffered within
        # 32 MiB scoped VMEM on every chip generation (v5e/v6e/v7x).
        budget = 2 * 1024 * 1024
        max_rows_per_tile = max(
            SUBLANE, (budget // (N * C * LANE * 4)) // SUBLANE * SUBLANE)
    if R <= max_rows_per_tile:
        return R                       # single row-tile: full dim, no 8-alignment needed
    return max(SUBLANE, (max_rows_per_tile // SUBLANE) * SUBLANE)


def inverse_frequency_cross_entropy(predict, target, reduction="mean",
                                    max_rows_per_tile=None):
    """predict, target: [N, C, H, W] (NCHW, same as PyTorch).  f32 or bf16 inputs
    (compute is f32).  Reproduces weight=None / ignore_index=None / argmax=False
    / softmax=True."""
    assert predict.shape == target.shape, (
        f"predict & target shape do not match. {predict.shape} != {target.shape}")
    assert reduction in ("mean", "sum"), "only 'mean' and 'sum' are implemented"
    # TODO(synk): reduction='none' (per-pixel [N, H, W] output) not implemented.
    # TODO(synk): class-weight path (self.weight, shape [C]) is skipped -- the
    # PyTorch broadcast of [C] against [N, C, H, W] multiplies along W and is
    # only well-defined when C == W, so the weight=None configuration is the
    # one reproduced here.

    N, C, H, W = predict.shape
    S = H * W
    R = pl.cdiv(S, LANE)                         # spatial rows of 128 lanes
    TR = _choose_tile_rows(N, C, R, max_rows_per_tile)
    num_tiles = pl.cdiv(R, TR)
    R_pad = num_tiles * TR
    S_pad = R_pad * LANE
    need_mask = S_pad != S

    p = predict.reshape(N, C, S)
    t = target.reshape(N, C, S)
    if need_mask:
        pad = S_pad - S
        p = jnp.pad(p, ((0, 0), (0, 0), (0, pad)))
        t = jnp.pad(t, ((0, 0), (0, 0), (0, pad)))   # zero target => zero loss
    p = p.reshape(N, C, R_pad, LANE)
    t = t.reshape(N, C, R_pad, LANE)

    cost = pl.CostEstimate(
        flops=10 * N * C * S_pad,
        transcendentals=N * C * S_pad + N * S_pad + C * S_pad,
        bytes_accessed=int(p.size * p.dtype.itemsize
                           + t.size * t.dtype.itemsize
                           + 2 * num_tiles * LANE * 4),
    )

    kernel = _make_ifce_kernel(S, TR, need_mask)
    in_block = pl.BlockSpec((N, C, TR, LANE), lambda i: (0, 0, i, 0))
    out_block = pl.BlockSpec((1, 1, LANE), lambda i: (i, 0, 0))

    loss_partials, inv_partials = pl.pallas_call(
        kernel,
        grid=(num_tiles,),
        in_specs=[in_block, in_block],
        out_specs=(out_block, out_block),
        out_shape=(
            jax.ShapeDtypeStruct((num_tiles, 1, LANE), jnp.float32),
            jax.ShapeDtypeStruct((num_tiles, 1, LANE), jnp.float32),
        ),
        compiler_params=pltpu.CompilerParams(
            dimension_semantics=("parallel",),
            vmem_limit_bytes=32 * 1024 * 1024,
        ),
        cost_estimate=cost,
    )(p, t)

    total_inv = jnp.sum(inv_partials)                    # global weight normalizer
    loss_sum = -jnp.sum(loss_partials) * (225.0 / total_inv)
    if reduction == "sum":
        return loss_sum
    return loss_sum / (N * S)                            # 'mean' over [N, H, W]


def _reference(predict, target):
    # Pure-JAX reference mirroring the PyTorch forward (weight=None,
    # softmax=True, argmax=False, reduction='mean').
    sm = jax.nn.softmax(predict, axis=1)
    tsum = jnp.sum(target, axis=0)
    inv = 1.0 / (tsum + EPS)
    w = inv / jnp.sum(inv) * 225.0
    loss = target * w[None, ...] * jnp.log(sm + EPS)
    per = -jnp.sum(loss, axis=1)
    return jnp.mean(per)


if __name__ == "__main__":
    key = jax.random.PRNGKey(0)
    k1, k2 = jax.random.split(key)

    # Primary small test: [2, 4, 16, 16] (single spatial tile, no padding).
    N, C, H, W = 2, 4, 16, 16
    predict = jax.random.normal(k1, (N, C, H, W), dtype=jnp.float32)
    labels = jax.random.randint(k2, (N, H, W), 0, C)
    target = jax.nn.one_hot(labels, C, axis=1, dtype=jnp.float32)  # [N, C, H, W]

    loss = jax.jit(inverse_frequency_cross_entropy)(predict, target)
    loss = jax.block_until_ready(loss)
    ref = _reference(predict, target)
    assert jnp.allclose(loss, ref, rtol=1e-3, atol=0.0), (loss, ref)

    # Secondary test: exercises the multi-tile grid + spatial padding mask
    # (S=2304 -> 18 rows of 128, TR=8 -> 3 tiles, 6 padded rows).
    k3, k4 = jax.random.split(k2)
    N2, C2, H2, W2 = 2, 4, 48, 48
    p2 = jax.random.normal(k3, (N2, C2, H2, W2), dtype=jnp.float32)
    l2 = jax.random.randint(k4, (N2, H2, W2), 0, C2)
    t2 = jax.nn.one_hot(l2, C2, axis=1, dtype=jnp.float32)
    loss2 = inverse_frequency_cross_entropy(p2, t2, max_rows_per_tile=8)
    loss2 = jax.block_until_ready(loss2)
    ref2 = _reference(p2, t2)
    assert jnp.allclose(loss2, ref2, rtol=1e-3, atol=0.0), (loss2, ref2)

    print("KERNEL_OK")
</pallas_src>

<mosaic_0001>
module attributes {stable_mosaic.version = 11 : i64} {
  func.func @kernel(%arg0: i32, %arg1: memref<2x4x2x128xf32, #tpu.memory_space<vmem>>, %arg2: memref<2x4x2x128xf32, #tpu.memory_space<vmem>>, %arg3: memref<1x1x128xf32, #tpu.memory_space<vmem>>, %arg4: memref<1x1x128xf32, #tpu.memory_space<vmem>>) attributes {dimension_semantics = [#tpu.dimension_semantics<parallel>], iteration_bounds = array<i64: 1>, scalar_prefetch = 0 : i64, scratch_operands = 0 : i64, tpu.core_type = #tpu.core_type<tc>, window_params = [{transform_indices = @transform_0, window_bounds = array<i64: 2, 4, 2, 128>}, {transform_indices = @transform_1, window_bounds = array<i64: 2, 4, 2, 128>}, {transform_indices = @transform_2, window_bounds = array<i64: 1, 1, 128>}, {transform_indices = @transform_3, window_bounds = array<i64: 1, 1, 128>}]} {
    %c0 = arith.constant 0 : index
    %c0_0 = arith.constant 0 : index
    %c0_1 = arith.constant 0 : index
    %c0_2 = arith.constant 0 : index
    %0 = vector.load %arg1[%c0, %c0_0, %c0_1, %c0_2] : memref<2x4x2x128xf32, #tpu.memory_space<vmem>>, vector<2x4x2x128xf32>
    %c0_3 = arith.constant 0 : index
    %c0_4 = arith.constant 0 : index
    %c0_5 = arith.constant 0 : index
    %c0_6 = arith.constant 0 : index
    %1 = vector.load %arg2[%c0_3, %c0_4, %c0_5, %c0_6] : memref<2x4x2x128xf32, #tpu.memory_space<vmem>>, vector<2x4x2x128xf32>
    %cst = arith.constant dense<0xFF800000> : vector<2x2x128xf32>
    %2 = vector.multi_reduction <maximumf>, %0, %cst [1] : vector<2x4x2x128xf32> to vector<2x2x128xf32>
    %3 = vector.shape_cast %2 : vector<2x2x128xf32> to vector<2x1x2x128xf32>
    %4 = vector.broadcast %3 : vector<2x1x2x128xf32> to vector<2x4x2x128xf32>
    %5 = arith.subf %0, %4 : vector<2x4x2x128xf32>
    %6 = math.exp %5 : vector<2x4x2x128xf32>
    %cst_7 = arith.constant dense<0.000000e+00> : vector<2x2x128xf32>
    %7 = vector.multi_reduction <add>, %6, %cst_7 [1] : vector<2x4x2x128xf32> to vector<2x2x128xf32>
    %8 = vector.shape_cast %7 : vector<2x2x128xf32> to vector<2x1x2x128xf32>
    %9 = math.log %8 : vector<2x1x2x128xf32>
    %10 = vector.broadcast %9 : vector<2x1x2x128xf32> to vector<2x4x2x128xf32>
    %11 = arith.subf %5, %10 : vector<2x4x2x128xf32>
    %cst_8 = arith.constant dense<0.000000e+00> : vector<4x2x128xf32>
    %12 = vector.multi_reduction <add>, %1, %cst_8 [0] : vector<2x4x2x128xf32> to vector<4x2x128xf32>
    %cst_9 = arith.constant 9.99999971E-10 : f32
    %13 = vector.broadcast %cst_9 : f32 to vector<4x2x128xf32>
    %14 = arith.addf %12, %13 : vector<4x2x128xf32>
    %cst_10 = arith.constant 1.000000e+00 : f32
    %15 = vector.broadcast %cst_10 : f32 to vector<4x2x128xf32>
    %16 = arith.divf %15, %14 : vector<4x2x128xf32>
    %cst_11 = arith.constant dense<0.000000e+00> : vector<2x128xf32>
    %17 = vector.multi_reduction <add>, %16, %cst_11 [0] : vector<4x2x128xf32> to vector<2x128xf32>
    %cst_12 = arith.constant dense<0.000000e+00> : vector<128xf32>
    %18 = vector.multi_reduction <add>, %17, %cst_12 [0] : vector<2x128xf32> to vector<128xf32>
    %19 = vector.shape_cast %18 : vector<128xf32> to vector<1x128xf32>
    %20 = vector.shape_cast %19 : vector<1x128xf32> to vector<1x1x128xf32>
    %c0_13 = arith.constant 0 : index
    %c0_14 = arith.constant 0 : index
    %c0_15 = arith.constant 0 : index
    %21 = vector.load %arg4[%c0_13, %c0_14, %c0_15] : memref<1x1x128xf32, #tpu.memory_space<vmem>>, vector<1x1x128xf32>
    tpu.vector_store %arg4[%c0_13, %c0_14, %c0_15], %20 {strides = array<i32>} : memref<1x1x128xf32, #tpu.memory_space<vmem>>, vector<1x1x128xf32>,
    %22 = vector.shape_cast %16 : vector<4x2x128xf32> to vector<1x4x2x128xf32>
    %23 = vector.broadcast %22 : vector<1x4x2x128xf32> to vector<2x4x2x128xf32>
    %24 = arith.mulf %1, %23 : vector<2x4x2x128xf32>
    %25 = arith.mulf %24, %11 : vector<2x4x2x128xf32>
    %cst_16 = arith.constant dense<0.000000e+00> : vector<128xf32>
    %26 = vector.multi_reduction <add>, %25, %cst_16 [0, 1, 2] : vector<2x4x2x128xf32> to vector<128xf32>
    %27 = vector.shape_cast %26 : vector<128xf32> to vector<1x1x1x128xf32>
    %28 = vector.shape_cast %27 : vector<1x1x1x128xf32> to vector<1x1x128xf32>
    %c0_17 = arith.constant 0 : index
    %c0_18 = arith.constant 0 : index
    %c0_19 = arith.constant 0 : index
    %29 = vector.load %arg3[%c0_17, %c0_18, %c0_19] : memref<1x1x128xf32, #tpu.memory_space<vmem>>, vector<1x1x128xf32>
    tpu.vector_store %arg3[%c0_17, %c0_18, %c0_19], %28 {strides = array<i32>} : memref<1x1x128xf32, #tpu.memory_space<vmem>>, vector<1x1x128xf32>,
    return
  }
  func.func @transform_0(%arg0: i32) -> (i32, i32, i32, i32) {
    %c0_i32 = arith.constant 0 : i32
    %c0_i32_0 = arith.constant 0 : i32
    %c0_i32_1 = arith.constant 0 : i32
    %c0_i32_2 = arith.constant 0 : i32
    return %c0_i32, %c0_i32_0, %arg0, %c0_i32_1 : i32, i32, i32, i32
  }
  func.func @transform_1(%arg0: i32) -> (i32, i32, i32, i32) {
    %c0_i32 = arith.constant 0 : i32
    %c0_i32_0 = arith.constant 0 : i32
    %c0_i32_1 = arith.constant 0 : i32
    %c0_i32_2 = arith.constant 0 : i32
    return %c0_i32, %c0_i32_0, %arg0, %c0_i32_1 : i32, i32, i32, i32
  }
  func.func @transform_2(%arg0: i32) -> (i32, i32, i32) {
    %c0_i32 = arith.constant 0 : i32
    %c0_i32_0 = arith.constant 0 : i32
    %c0_i32_1 = arith.constant 0 : i32
    return %arg0, %c0_i32, %c0_i32_0 : i32, i32, i32
  }
  func.func @transform_3(%arg0: i32) -> (i32, i32, i32) {
    %c0_i32 = arith.constant 0 : i32
    %c0_i32_0 = arith.constant 0 : i32
    %c0_i32_1 = arith.constant 0 : i32
    return %arg0, %c0_i32, %c0_i32_0 : i32, i32, i32
  }
}

</mosaic_0001>

<bundles_post_ra>
// kernel: inverse_frequency_cross_entropy.1
= control target key start
LH: loop header
LB: loop body
LE: loop exit
PB: predicated region body
PF: predicated region fallthrough
CT: control target
= control target key end

     0   :  { %vm29_vm0 = vcmask 1041408   ;;  %s382_s0 = inlined_call_operand.vmem [shape: f32[2,4,2,128], index: 0, kind: input, shape index: {}]   ;;  %s383_s1 = inlined_call_operand.vmem [shape: f32[2,4,2,128], index: 1, kind: input, shape index: {}]   ;;  %s384_s3 = inlined_call_operand.vmem [shape: f32[1,1,128], index: 3, kind: output, shape index: {1}]   ;;  %s385_s2 = inlined_call_operand.vmem [shape: f32[1,1,128], index: 2, kind: output, shape index: {0}]  }
   0x1   :  { %v13_v0 = vld [vmem:[%s382_s0] sm:$0x3]  ;;  %v14_v1 = vld [vmem:[%s382_s0 + $0x2] sm:$0x3]  ;;  %v15_v2 = vld [vmem:[%s382_s0 + $0x4] sm:$0x3] }
   0x2   :  { %v16_v3 = vld [vmem:[%s382_s0 + $0x6] sm:$0x3]  ;;  %v17_v4 = vld [vmem:[%s382_s0 + $0x8] sm:$0x3]  ;;  %v18_v5 = vld [vmem:[%s382_s0 + $0xa] sm:$0x3] }
   0x3   :  { %v19_v6 = vld [vmem:[%s382_s0 + $0xc] sm:$0x3]  ;;  %v20_v7 = vld [vmem:[%s382_s0 + $0xe] sm:$0x3]  ;;  %v254_v8 = vld [vmem:[%s383_s1] sm:$0x3] }
   0x4   :  { %v259_v9 = vld [vmem:[%s383_s1 + $0x8] sm:$0x3]  ;;  %v30_v10 = vsel %vm29_vm0, %v13_v0, -inf  ;;  %v31_v11 = vsel %vm29_vm0, %v14_v1, -inf  ;;  %v32_v12 = vsel %vm29_vm0, %v15_v2, -inf  ;;  %v34_v13 = vsel %vm29_vm0, %v16_v3, -inf }
   0x5   :  { %v33_v14 = vmax.f32 %v30_v10, %v32_v12  ;;  %v35_v15 = vmax.f32 %v31_v11, %v34_v13  ;;  %v37_v16 = vsel %vm29_vm0, %v17_v4, -inf  ;;  %v38_v17 = vsel %vm29_vm0, %v18_v5, -inf  ;;  %v276_v25 = vld [vmem:[%s383_s1 + $0x2] sm:$0x3]  ;;  %v281_v26 = vld [vmem:[%s383_s1 + $0xa] sm:$0x3] }
   0x6   :  { %v39_v18 = vsel %vm29_vm0, %v19_v6, -inf  ;;  %v41_v19 = vsel %vm29_vm0, %v20_v7, -inf  ;;  %v94_v20 = vsel %vm29_vm0, %v254_v8, 0.0  ;;  %v95_v24 = vsel %vm29_vm0, %v259_v9, 0.0  ;;  %v292_v31 = vld [vmem:[%s383_s1 + $0x4] sm:$0x3] }
   0x7   :  { %v36_v21 = vmax.f32 %v33_v14, %v35_v15  ;;  %v40_v22 = vmax.f32 %v37_v16, %v39_v18  ;;  %v42_v23 = vmax.f32 %v38_v17, %v41_v19  ;;  %v297_v32 = vld [vmem:[%s383_s1 + $0xc] sm:$0x3]  ;;  %v96_v34 = vadd.f32 %v95_v24, %v94_v20  ;;  %v304_v35 = vld [vmem:[%s383_s1 + $0x6] sm:$0x3]  ;;  %v309_v36 = vld [vmem:[%s383_s1 + $0xe] sm:$0x3] }
   0x8   :  { %v97_v39 = vsel %vm29_vm0, %v276_v25, 0.0  ;;  %v98_v40 = vsel %vm29_vm0, %v281_v26, 0.0  ;;  %v100_v47 = vsel %vm29_vm0, %v292_v31, 0.0  ;;  %v101_v48 = vsel %vm29_vm0, %v297_v32, 0.0 }
   0x9   :  { %v43_v27 = vmax.f32 %v40_v22, %v42_v23  ;;  %v283_v28 = vsub.f32 %v13_v0, %v36_v21  ;;  %v285_v29 = vsub.f32 %v14_v1, %v36_v21  ;;  %v287_v30 = vsub.f32 %v15_v2, %v36_v21 }
   0xa   :  { %v299_v33 = vsub.f32 %v16_v3, %v36_v21  ;;  %v103_v50 = vsel %vm29_vm0, %v304_v35, 0.0  ;;  %v104_v51 = vsel %vm29_vm0, %v309_v36, 0.0  ;;  %v99_v53 = vadd.f32 %v98_v40, %v97_v39 }
   0xb   :  { %v311_v37 = vsub.f32 %v17_v4, %v43_v27  ;;  %v313_v38 = vsub.f32 %v18_v5, %v43_v27  ;;  %v319_v41 = vsub.f32 %v19_v6, %v43_v27  ;;  %v52_v42 = vmul.f32 1.442695, %v283_v28 }
   0xc   :  { %v54_v43 = vmul.f32 1.442695, %v285_v29  ;;  %v56_v44 = vmul.f32 1.442695, %v287_v30  ;;  %v324_v45 = vsub.f32 %v20_v7, %v43_v27  ;;  %v58_v46 = vmul.f32 1.442695, %v299_v33 }
   0xd   :  { %179 = vpow2.f32 %v52_v42  ;;  %v60_v49 = vmul.f32 1.442695, %v311_v37  ;;  %v62_v52 = vmul.f32 1.442695, %v313_v38  ;;  %v64_v54 = vmul.f32 1.442695, %v319_v41 }
   0xe   :  { %181 = vpow2.f32 %v54_v43  ;;  %v102_v55 = vadd.f32 %v101_v48, %v100_v47  ;;  %v66_v56 = vmul.f32 1.442695, %v324_v45  ;;  %v105_v57 = vadd.f32 %v104_v51, %v103_v50 }
   0xf   :  { %183 = vpow2.f32 %v56_v44  ;;  %v106_v58 = vadd.f32 1e-09, %v96_v34  ;;  %v107_v59 = vadd.f32 1e-09, %v99_v53 }
  0x10   :  { %185 = vpow2.f32 %v58_v46  ;;  %v108_v60 = vadd.f32 1e-09, %v102_v55  ;;  %v109_v61 = vadd.f32 1e-09, %v105_v57 }
  0x11   :  { %187 = vpow2.f32 %v60_v49 }
  0x12   :  { %189 = vpow2.f32 %v62_v52 }
  0x13   :  { %191 = vpow2.f32 %v64_v54 }
  0x14   :  { %193 = vpow2.f32 %v66_v56 }
  0x15   :  { %195 = vrcp.f32 %v106_v58 }
  0x16   :  { %197 = vrcp.f32 %v107_v59 }
  0x17   :  { %v180_v62 = vpop.eup %179  ;;  %199 = vrcp.f32 %v108_v60 }
  0x18   :  { %v182_v63 = vpop.eup %181  ;;  %v68_v0 = vsel %vm29_vm0, %v180_v62, 0.0  ;;  %201 = vrcp.f32 %v109_v61 }
  0x19   :  { %v184_v1 = vpop.eup %183  ;;  %v69_v2 = vsel %vm29_vm0, %v182_v63, 0.0 }
  0x1a   :  { %v186_v3 = vpop.eup %185  ;;  %v70_v4 = vadd.f32 %v69_v2, %v68_v0  ;;  %v71_v5 = vsel %vm29_vm0, %v184_v1, 0.0 }
  0x1b   :  { %v188_v6 = vpop.eup %187  ;;  %v73_v7 = vsel %vm29_vm0, %v186_v3, 0.0 }
  0x1c   :  { %v190_v10 = vpop.eup %189  ;;  %v72_v11 = vadd.f32 %v71_v5, %v70_v4  ;;  %v75_v12 = vsel %vm29_vm0, %v188_v6, 0.0 }
  0x1d   :  { %v192_v13 = vpop.eup %191  ;;  %v76_v14 = vsel %vm29_vm0, %v190_v10, 0.0 }
  0x1e   :  { %v194_v15 = vpop.eup %193  ;;  %v74_v16 = vadd.f32 %v73_v7, %v72_v11  ;;  %v77_v17 = vadd.f32 %v76_v14, %v75_v12  ;;  %v78_v18 = vsel %vm29_vm0, %v192_v13, 0.0 }
  0x1f   :  { %v196_v19 = vpop.eup %195  ;;  %v80_v20 = vsel %vm29_vm0, %v194_v15, 0.0 }
  0x20   :  { %v198_v21 = vpop.eup %197  ;;  %v79_v22 = vadd.f32 %v78_v18, %v77_v17  ;;  %203 = vlog2.f32 %v74_v16  ;;  %v118_v23 = vsel %vm29_vm0, %v196_v19, 0.0  ;;  %v133_v50 = vmul.f32 %v196_v19, %v254_v8 }
  0x21   :  { %v200_v24 = vpop.eup %199  ;;  %v119_v27 = vsel %vm29_vm0, %v198_v21, 0.0  ;;  %v134_v53 = vmul.f32 %v198_v21, %v276_v25  ;;  %v137_v8 = vmul.f32 %v196_v19, %v259_v9 }
  0x22   :  { %v202_v34 = vpop.eup %201  ;;  %v81_v39 = vadd.f32 %v80_v20, %v79_v22  ;;  %v120_v40 = vadd.f32 %v119_v27, %v118_v23  ;;  %v121_v42 = vsel %vm29_vm0, %v200_v24, 0.0  ;;  %v135_v54 = vmul.f32 %v200_v24, %v292_v31 }
  0x23   :  { %v123_v43 = vsel %vm29_vm0, %v202_v34, 0.0  ;;  %v136_v55 = vmul.f32 %v202_v34, %v304_v35  ;;  %v139_v9 = vmul.f32 %v200_v24, %v297_v32 }
  0x24   :  { %205 = vlog2.f32 %v81_v39  ;;  %v122_v44 = vadd.f32 %v121_v42, %v120_v40 }
  0x26   :  { %v124_v46 = vadd.f32 %v123_v43, %v122_v44 }
  0x28   :  { %v125_v47 = vsel %vm29_vm0, %v124_v46, 0.0 }
  0x29   :  { %v126_v48 = vrot.slane %v125_v47, 4 }
  0x2a   :  { %v204_v49 = vpop.eup %203 }
  0x2b   :  { %v83_v51 = vmul.f32 0.6931472, %v204_v49  ;;  %v127_v52 = vadd.f32 %v126_v48, %v125_v47 }
  0x2d   :  { %v86_v56 = vsub.f32 %v283_v28, %v83_v51  ;;  %v87_v57 = vsub.f32 %v285_v29, %v83_v51  ;;  %v88_v58 = vsub.f32 %v287_v30, %v83_v51  ;;  %v89_v59 = vsub.f32 %v299_v33, %v83_v51 }
  0x2e   :  { %v206_v60 = vpop.eup %205  ;;  %v128_v61 = vrot.slane %v127_v52, 2  ;;  %v138_v28 = vmul.f32 %v198_v21, %v281_v26 }
  0x2f   :  { %v85_v62 = vmul.f32 0.6931472, %v206_v60  ;;  %v141_v63 = vmul.f32 %v133_v50, %v86_v56  ;;  %v142_v0 = vmul.f32 %v134_v53, %v87_v57  ;;  %v143_v25 = vmul.f32 %v135_v54, %v88_v58 }
  0x30   :  { %v129_v1 = vadd.f32 %v128_v61, %v127_v52  ;;  %v144_v29 = vmul.f32 %v136_v55, %v89_v59 }
  0x31   :  { %v90_v31 = vsub.f32 %v311_v37, %v85_v62  ;;  %v91_v35 = vsub.f32 %v313_v38, %v85_v62  ;;  %v149_v30 = vsel %vm29_vm0, %v141_v63, 0.0  ;;  %v150_v33 = vsel %vm29_vm0, %v142_v0, 0.0 }
  0x32   :  { %v130_v2 = vrot.slane %v129_v1, 1  ;;  %v92_v3 = vsub.f32 %v319_v41, %v85_v62  ;;  %v152_v5 = vsel %vm29_vm0, %v143_v25, 0.0  ;;  %v151_v7 = vadd.f32 %v150_v33, %v149_v30 }
  0x33   :  { %v145_v4 = vmul.f32 %v137_v8, %v90_v31  ;;  %v93_v37 = vsub.f32 %v324_v45, %v85_v62  ;;  %v140_v38 = vmul.f32 %v202_v34, %v309_v36  ;;  %v146_v26 = vmul.f32 %v138_v28, %v91_v35 }
  0x34   :  { %v131_v6 = vadd.f32 %v130_v2, %v129_v1  ;;  %v154_v10 = vsel %vm29_vm0, %v144_v29, 0.0  ;;  %v153_v11 = vadd.f32 %v152_v5, %v151_v7  ;;  %v147_v41 = vmul.f32 %v139_v9, %v92_v3 }
  0x35   :  { %v156_v32 = vsel %vm29_vm0, %v145_v4, 0.0  ;;  %v148_v13 = vmul.f32 %v140_v38, %v93_v37  ;;  %v158_v14 = vsel %vm29_vm0, %v146_v26, 0.0 }
  0x36   :  { %132 = vst [vmem:[%s384_s3] sm:$0x1] %v131_v6  ;;  %v155_v12 = vadd.f32 %v154_v10, %v153_v11  ;;  %v160_v45 = vsel %vm29_vm0, %v147_v41, 0.0 }
  0x37   :  { %v162_v36 = vsel %vm29_vm0, %v148_v13, 0.0 }
  0x38   :  { %v157_v15 = vadd.f32 %v156_v32, %v155_v12 }
  0x3a   :  { %v159_v16 = vadd.f32 %v158_v14, %v157_v15 }
  0x3c   :  { %v161_v17 = vadd.f32 %v160_v45, %v159_v16 }
  0x3e   :  { %v163_v18 = vadd.f32 %v162_v36, %v161_v17 }
  0x40   :  { %v164_v19 = vrot.slane %v163_v18, 4 }
  0x42   :  { %v165_v20 = vadd.f32 %v164_v19, %v163_v18 }
  0x44   :  { %v166_v21 = vrot.slane %v165_v20, 2 }
  0x46   :  { %v167_v22 = vadd.f32 %v166_v21, %v165_v20 }
  0x48   :  { %v168_v23 = vrot.slane %v167_v22, 1 }
  0x4a   :  { %v169_v24 = vadd.f32 %v168_v23, %v167_v22 }
  0x4c   :  { %170 = vst [vmem:[%s385_s2] sm:$0x1] %v169_v24 }

</bundles_post_ra>
